<compile_context>
chip_gen: v6e
topology: v6e:2x2x1
jax: 0.10.0
libtpu: 0.0.40
codegen_flags: <defaults>
</compile_context>

<pallas_src>
import functools

import jax
import jax.numpy as jnp
from jax import lax
from jax.experimental import pallas as pl
from jax.experimental.pallas import tpu as pltpu

BN_EPS = 1e-5
LANE = 128


def _round_up(x, m):
    return (x + m - 1) // m * m


def _tpu_defaults():
    """(tile_m, vmem_limit_bytes) chosen per TPU generation."""
    try:
        vmem = int(pltpu.get_tpu_info().vmem_capacity_bytes)
    except Exception:  # query unavailable -> conservative (v7x-sized) defaults
        vmem = 64 * 1024 * 1024
    if vmem >= 100 * 1024 * 1024:          # v5e / v6e: 128 MiB physical VMEM
        return 2048, 96 * 1024 * 1024
    return 1024, 32 * 1024 * 1024          # v7x: 64 MiB per TensorCore


def _bn_elu(y, scale, shift):
    """Affine batch-norm + ELU(alpha=1), all in f32."""
    z = y * scale + shift
    # expm1-quality negative branch built from guaranteed-lowered ops.
    neg = jnp.exp(z) - 1.0
    neg = jnp.where(jnp.abs(z) < 1e-3, z + 0.5 * z * z, neg)
    return jnp.where(z > 0.0, z, neg)


# --------------------------------------------------------------- kernels ----

def _stats_kernel(p_ref, w_ref, stats_ref, *, m_valid):
    """Fused path, phase 1: conv-as-matmul -> per-tile BN partial sums only."""
    i = pl.program_id(0)
    tile_m = p_ref.shape[0]
    y = jnp.dot(p_ref[...], w_ref[...], preferred_element_type=jnp.float32)
    # Mask rows that are pure M-padding so they don't pollute batch stats.
    row = lax.broadcasted_iota(jnp.int32, (tile_m, 1), 0) + i * tile_m
    ym = jnp.where(row < m_valid, y, 0.0)
    s = jnp.sum(ym, axis=0, keepdims=True)           # (1, tc)
    ss = jnp.sum(ym * ym, axis=0, keepdims=True)     # (1, tc)
    stats_ref[...] = jnp.concatenate([s, ss], axis=0)[None]   # (1, 2, tc)


def _stats_stage_kernel(p_ref, w_ref, y_ref, stats_ref, *, m_valid):
    """Staged path, phase 1: matmul -> bf16 y staging + per-tile BN partials."""
    i = pl.program_id(0)
    tile_m = p_ref.shape[0]
    y = jnp.dot(p_ref[...], w_ref[...], preferred_element_type=jnp.float32)
    y_ref[...] = y.astype(y_ref.dtype)   # bf16 staging halves the y round trip
    row = lax.broadcasted_iota(jnp.int32, (tile_m, 1), 0) + i * tile_m
    ym = jnp.where(row < m_valid, y, 0.0)
    s = jnp.sum(ym, axis=0, keepdims=True)
    ss = jnp.sum(ym * ym, axis=0, keepdims=True)
    stats_ref[...] = jnp.concatenate([s, ss], axis=0)[None]


def _matmul_bn_elu_kernel(p_ref, w_ref, scale_ref, shift_ref, o_ref):
    """Fused path, phase 2: recompute matmul, BN + ELU, channel-major store."""
    y = jnp.dot(p_ref[...], w_ref[...], preferred_element_type=jnp.float32)
    out = _bn_elu(y, scale_ref[...], shift_ref[...])
    o_ref[...] = out.T          # (tc, tm): XLU transpose, lane-dense store


def _bn_elu_kernel(y_ref, scale_ref, shift_ref, o_ref):
    """Staged path, phase 2: read bf16 y, BN + ELU, channel-major store."""
    y = y_ref[...].astype(jnp.float32)
    out = _bn_elu(y, scale_ref[...], shift_ref[...])
    o_ref[...] = out.T


# --------------------------------------------------------------- wrapper ----

def block_forward(x, weight, bias, gamma, beta, *, k=3, stride=2, pad=1,
                  tile_m=None, vmem_limit_bytes=None, stage_y=None,
                  compute_dtype=jnp.bfloat16):
    """Pallas forward of Block (down=True): Conv2d(s=2,p=1) -> BN(train) -> ELU.

    x: (N, Cin, H, W); weight: (Cout, Cin, k, k); bias/gamma/beta: (Cout,)
    returns (N, Cout, Ho, Wo) float32.
    """
    n, cin, h, w = x.shape
    cout = weight.shape[0]
    ho = (h + 2 * pad - k) // stride + 1
    wo = (w + 2 * pad - k) // stride + 1
    kk = cin * k * k
    m = n * ho * wo
    f32 = jnp.float32

    # `bias` is intentionally unused: a per-channel bias added before
    # training-mode BatchNorm cancels exactly (mean/var shift absorbs it).
    del bias

    if tile_m is None or vmem_limit_bytes is None:
        dm, dv = _tpu_defaults()
        tile_m = dm if tile_m is None else tile_m
        vmem_limit_bytes = dv if vmem_limit_bytes is None else vmem_limit_bytes
    if stage_y is None:
        # Recompute the matmul in phase 2 when re-reading the (thin) patch
        # tiles is cheaper than round-tripping the conv output through HBM.
        stage_y = kk > 256

    # im2col via XLA's fused patch extractor, directly in bf16 (exact: the
    # patch "conv" kernel is one-hot).  Feature order is (c, kh, kw)-major,
    # matching PyTorch's weight.reshape(Cout, Cin*k*k).
    patches = lax.conv_general_dilated_patches(
        x.astype(compute_dtype), (k, k), (stride, stride),
        ((pad, pad), (pad, pad)))                   # (N, Cin*k*k, Ho, Wo)
    patches = patches.transpose(0, 2, 3, 1).reshape(m, kk)
    # TODO(synk): fully fuse patch extraction into the kernel (k*k shifted
    # matmuls over an NHWC input) to remove this k*k HBM expansion entirely.

    # Channel padding to lane width; K is left unpadded (full-dim blocks).
    c_pad = _round_up(cout, LANE)
    tc = 256 if c_pad % 256 == 0 else LANE   # fill the 256x256 MXU on v6e/v7x

    # M tile bounded by a per-step VMEM budget (double-buffered tiles).
    budget = vmem_limit_bytes // 2
    resident = 4 * kk * tc                   # (kk, tc) bf16 weight, 2 buffers
    per_row = 4 * kk + 16 * tc               # patch/y/out tiles + f32 temps
    tm_cap = max(LANE, (max(budget - resident, 0) // per_row) // LANE * LANE)
    # TODO(synk): for very large kk*tc (v7x 64 MiB VMEM) add a K grid axis with
    # an f32 accumulator scratch instead of shrinking tile_m.
    tm = (min(tile_m, tm_cap, _round_up(m, LANE)) // LANE) * LANE
    tm = max(tm, LANE)
    m_pad = _round_up(m, tm)
    n_m, n_c = m_pad // tm, c_pad // tc

    p = jnp.pad(patches, ((0, m_pad - m), (0, 0)))            # (m_pad, kk) bf16
    w_flat = jnp.pad(weight.reshape(cout, kk).T.astype(compute_dtype),
                     ((0, 0), (0, c_pad - cout)))             # (kk, c_pad) bf16

    cparams = pltpu.CompilerParams(
        dimension_semantics=("parallel", "parallel"),   # dual-TC friendly (v7x)
        vmem_limit_bytes=vmem_limit_bytes)
    grid = (n_m, n_c)
    p_spec = pl.BlockSpec((tm, kk), lambda i, j: (i, 0))
    # NOTE: w/scale/shift are grid-resident; pipeline_mode=pl.Buffered(1) could
    # drop their second buffer (a v7x VMEM nicety) — left at the default here.
    w_spec = pl.BlockSpec((kk, tc), lambda i, j: (0, j))
    v_spec = pl.BlockSpec((1, tc), lambda i, j: (0, j))
    y_spec = pl.BlockSpec((tm, tc), lambda i, j: (i, j))
    stats_spec = pl.BlockSpec((1, 2, tc), lambda i, j: (i, 0, j))
    out_spec = pl.BlockSpec((tc, tm), lambda i, j: (j, i))
    stats_shape = jax.ShapeDtypeStruct((n_m, 2, c_pad), f32)
    out_shape = jax.ShapeDtypeStruct((c_pad, m_pad), f32)

    # Phase 1: batch statistics (and, for large K, a bf16-staged conv output).
    if stage_y:
        y_stage, stats = pl.pallas_call(
            functools.partial(_stats_stage_kernel, m_valid=m),
            grid=grid,
            in_specs=[p_spec, w_spec],
            out_specs=(y_spec, stats_spec),
            out_shape=(jax.ShapeDtypeStruct((m_pad, c_pad), compute_dtype),
                       stats_shape),
            compiler_params=cparams,
        )(p, w_flat)
    else:
        stats = pl.pallas_call(
            functools.partial(_stats_kernel, m_valid=m),
            grid=grid,
            in_specs=[p_spec, w_spec],
            out_specs=stats_spec,
            out_shape=stats_shape,
            compiler_params=cparams,
        )(p, w_flat)

    # Tiny cross-tile reduction (XLA): batch stats -> per-channel scale/shift.
    tot = jnp.sum(stats, axis=0)                       # (2, c_pad)
    inv_m = 1.0 / float(m)
    mean = tot[0] * inv_m
    var = jnp.maximum(tot[1] * inv_m - mean * mean, 0.0)   # guard cancellation
    inv_std = lax.rsqrt(var + BN_EPS)   # padded channels hit 1/sqrt(eps); sliced off
    g = jnp.pad(gamma.astype(f32), (0, c_pad - cout))
    bt = jnp.pad(beta.astype(f32), (0, c_pad - cout))
    scale = (g * inv_std)[None]                        # (1, c_pad)
    shift = (bt - mean * g * inv_std)[None]
    # TODO(synk): PyTorch train-mode BN also updates running_mean/running_var;
    # those state updates are not produced here.

    # Phase 2: BN affine + ELU, written channel-major (lane dim = M tile).
    if stage_y:
        out_cm = pl.pallas_call(
            _bn_elu_kernel,
            grid=grid,
            in_specs=[y_spec, v_spec, v_spec],
            out_specs=out_spec,
            out_shape=out_shape,
            compiler_params=cparams,
        )(y_stage, scale, shift)
    else:
        out_cm = pl.pallas_call(
            _matmul_bn_elu_kernel,
            grid=grid,
            in_specs=[p_spec, w_spec, v_spec, v_spec],
            out_specs=out_spec,
            out_shape=out_shape,
            compiler_params=cparams,
        )(p, w_flat, scale, shift)

    # (C, M) channel-major slab -> NCHW.  The lane-dim transpose happened on
    # the XLU inside the kernel; only a cheap leading-axis permute remains.
    out = out_cm[:cout, :m].reshape(cout, n, ho, wo)
    return out.transpose(1, 0, 2, 3)


# ------------------------------------------------------------- reference ----

def _reference_forward(x, weight, bias, gamma, beta, *, stride=2, pad=1):
    """Pure-JAX f32 reference (conv + train-mode BN + ELU)."""
    y = lax.conv_general_dilated(
        x.astype(jnp.float32), weight.astype(jnp.float32),
        window_strides=(stride, stride), padding=((pad, pad), (pad, pad)),
        dimension_numbers=("NCHW", "OIHW", "NCHW"),
        precision=lax.Precision.HIGHEST)
    y = y + bias.reshape(1, -1, 1, 1)
    mean = jnp.mean(y, axis=(0, 2, 3), keepdims=True)
    var = jnp.mean((y - mean) ** 2, axis=(0, 2, 3), keepdims=True)
    z = (y - mean) * lax.rsqrt(var + BN_EPS)
    z = z * gamma.reshape(1, -1, 1, 1) + beta.reshape(1, -1, 1, 1)
    return jnp.where(z > 0, z, jnp.expm1(z))


if __name__ == "__main__":
    key = jax.random.PRNGKey(0)
    kx, kw, kb = jax.random.split(key, 3)

    N, Cin, H, W = 2, 4, 16, 16
    Cout, K = 8, 3

    x = jax.random.normal(kx, (N, Cin, H, W), dtype=jnp.float32)
    fan_in = Cin * K * K
    weight = jax.random.normal(kw, (Cout, Cin, K, K), dtype=jnp.float32) / jnp.sqrt(fan_in)
    bias = jax.random.normal(kb, (Cout,), dtype=jnp.float32) * 0.1
    gamma = jnp.ones((Cout,), dtype=jnp.float32)   # BN weight init
    beta = jnp.zeros((Cout,), dtype=jnp.float32)   # BN bias init

    ref = _reference_forward(x, weight, bias, gamma, beta)

    # Fused (matmul-recompute) path — the default for small K = Cin*k*k.
    fwd = jax.jit(block_forward)
    out = jax.block_until_ready(fwd(x, weight, bias, gamma, beta))
    assert out.shape == (N, Cout, H // 2, W // 2), out.shape
    err_a = float(jnp.max(jnp.abs(out - ref)))
    assert err_a < 4e-2, err_a     # bf16 MXU operands, f32 accumulation

    # Staged (bf16 y) path — auto-selected for large K; forced here so both
    # code paths compile and are numerically checked.
    fwd_b = jax.jit(functools.partial(block_forward, stage_y=True))
    out_b = jax.block_until_ready(fwd_b(x, weight, bias, gamma, beta))
    err_b = float(jnp.max(jnp.abs(out_b - ref)))
    assert err_b < 6e-2, err_b     # extra bf16 rounding from y staging

    # TODO(synk): down=False branch (Upsample(scale_factor=2) + stride-1 conv)
    # is not implemented; only the default down=True path is covered.
    print("KERNEL_OK")
</pallas_src>

<mosaic_0001>
module attributes {stable_mosaic.version = 11 : i64} {
  func.func @_stats_kernel(%arg0: i32, %arg1: i32, %arg2: memref<128x36xbf16, #tpu.memory_space<vmem>>, %arg3: memref<36x128xbf16, #tpu.memory_space<vmem>>, %arg4: memref<1x2x128xf32, #tpu.memory_space<vmem>>) attributes {dimension_semantics = [#tpu.dimension_semantics<parallel>, #tpu.dimension_semantics<parallel>], iteration_bounds = array<i64: 1, 1>, scalar_prefetch = 0 : i64, scratch_operands = 0 : i64, tpu.core_type = #tpu.core_type<tc>, window_params = [{transform_indices = @transform_0, window_bounds = array<i64: 128, 36>}, {transform_indices = @transform_1, window_bounds = array<i64: 36, 128>}, {transform_indices = @transform_2, window_bounds = array<i64: 1, 2, 128>}]} {
    %c0 = arith.constant 0 : index
    %c0_0 = arith.constant 0 : index
    %0 = vector.load %arg2[%c0, %c0_0] : memref<128x36xbf16, #tpu.memory_space<vmem>>, vector<128x36xbf16>
    %c0_1 = arith.constant 0 : index
    %c0_2 = arith.constant 0 : index
    %1 = vector.load %arg3[%c0_1, %c0_2] : memref<36x128xbf16, #tpu.memory_space<vmem>>, vector<36x128xbf16>
    %cst = arith.constant dense<0.000000e+00> : vector<128x128xf32>
    %2 = tpu.matmul %0, %1, %cst {dimension_numbers = #tpu.dot_dimension_numbers<[1], [0], [0], [1], [0, 0, 1, 1], [], []>} : vector<128x36xbf16>, vector<36x128xbf16>, vector<128x128xf32> -> vector<128x128xf32>
    %3 = tpu.iota {dimensions = array<i32: 0>} : vector<128x1xi32>
    %c128_i32 = arith.constant 128 : i32
    %4 = arith.muli %arg0, %c128_i32 : i32
    %5 = vector.broadcast %4 : i32 to vector<128x1xi32>
    %6 = arith.addi %3, %5 : vector<128x1xi32>
    %c128_i32_3 = arith.constant 128 : i32
    %7 = vector.broadcast %c128_i32_3 : i32 to vector<128x1xi32>
    %8 = arith.cmpi slt, %6, %7 : vector<128x1xi32>
    %cst_4 = arith.constant 0.000000e+00 : f32
    %9 = vector.shape_cast %8 : vector<128x1xi1> to vector<128x1xi1>
    %10 = vector.broadcast %9 : vector<128x1xi1> to vector<128x128xi1>
    %11 = vector.broadcast %cst_4 : f32 to vector<128x128xf32>
    %12 = arith.select %10, %2, %11 : vector<128x128xi1>, vector<128x128xf32>
    %cst_5 = arith.constant dense<0.000000e+00> : vector<128xf32>
    %13 = vector.multi_reduction <add>, %12, %cst_5 [0] : vector<128x128xf32> to vector<128xf32>
    %14 = vector.shape_cast %13 : vector<128xf32> to vector<1x128xf32>
    %15 = arith.mulf %12, %12 : vector<128x128xf32>
    %cst_6 = arith.constant dense<0.000000e+00> : vector<128xf32>
    %16 = vector.multi_reduction <add>, %15, %cst_6 [0] : vector<128x128xf32> to vector<128xf32>
    %17 = vector.shape_cast %16 : vector<128xf32> to vector<1x128xf32>
    %18 = tpu.concatenate %14, %17 in 0 : vector<1x128xf32>, vector<1x128xf32> -> vector<2x128xf32>
    %19 = vector.shape_cast %18 : vector<2x128xf32> to vector<1x2x128xf32>
    %c0_7 = arith.constant 0 : index
    %c0_8 = arith.constant 0 : index
    %c0_9 = arith.constant 0 : index
    %20 = vector.load %arg4[%c0_7, %c0_8, %c0_9] : memref<1x2x128xf32, #tpu.memory_space<vmem>>, vector<1x2x128xf32>
    tpu.vector_store %arg4[%c0_7, %c0_8, %c0_9], %19 {strides = array<i32>} : memref<1x2x128xf32, #tpu.memory_space<vmem>>, vector<1x2x128xf32>,
    return
  }
  func.func @transform_0(%arg0: i32, %arg1: i32) -> (i32, i32) {
    %c0_i32 = arith.constant 0 : i32
    %c0_i32_0 = arith.constant 0 : i32
    return %arg0, %c0_i32 : i32, i32
  }
  func.func @transform_1(%arg0: i32, %arg1: i32) -> (i32, i32) {
    %c0_i32 = arith.constant 0 : i32
    %c0_i32_0 = arith.constant 0 : i32
    return %c0_i32, %arg1 : i32, i32
  }
  func.func @transform_2(%arg0: i32, %arg1: i32) -> (i32, i32, i32) {
    %c0_i32 = arith.constant 0 : i32
    %c0_i32_0 = arith.constant 0 : i32
    return %arg0, %c0_i32, %arg1 : i32, i32, i32
  }
}

module attributes {stable_mosaic.version = 11 : i64} {
  func.func @_matmul_bn_elu_kernel(%arg0: i32, %arg1: i32, %arg2: memref<128x36xbf16, #tpu.memory_space<vmem>>, %arg3: memref<36x128xbf16, #tpu.memory_space<vmem>>, %arg4: memref<1x128xf32, #tpu.memory_space<vmem>>, %arg5: memref<1x128xf32, #tpu.memory_space<vmem>>, %arg6: memref<128x128xf32, #tpu.memory_space<vmem>>) attributes {dimension_semantics = [#tpu.dimension_semantics<parallel>, #tpu.dimension_semantics<parallel>], iteration_bounds = array<i64: 1, 1>, scalar_prefetch = 0 : i64, scratch_operands = 0 : i64, tpu.core_type = #tpu.core_type<tc>, window_params = [{transform_indices = @transform_0, window_bounds = array<i64: 128, 36>}, {transform_indices = @transform_1, window_bounds = array<i64: 36, 128>}, {transform_indices = @transform_2, window_bounds = array<i64: 1, 128>}, {transform_indices = @transform_3, window_bounds = array<i64: 1, 128>}, {transform_indices = @transform_4, window_bounds = array<i64: 128, 128>}]} {
    %c0 = arith.constant 0 : index
    %c0_0 = arith.constant 0 : index
    %0 = vector.load %arg2[%c0, %c0_0] : memref<128x36xbf16, #tpu.memory_space<vmem>>, vector<128x36xbf16>
    %c0_1 = arith.constant 0 : index
    %c0_2 = arith.constant 0 : index
    %1 = vector.load %arg3[%c0_1, %c0_2] : memref<36x128xbf16, #tpu.memory_space<vmem>>, vector<36x128xbf16>
    %cst = arith.constant dense<0.000000e+00> : vector<128x128xf32>
    %2 = tpu.matmul %0, %1, %cst {dimension_numbers = #tpu.dot_dimension_numbers<[1], [0], [0], [1], [0, 0, 1, 1], [], []>} : vector<128x36xbf16>, vector<36x128xbf16>, vector<128x128xf32> -> vector<128x128xf32>
    %c0_3 = arith.constant 0 : index
    %c0_4 = arith.constant 0 : index
    %3 = vector.load %arg4[%c0_3, %c0_4] : memref<1x128xf32, #tpu.memory_space<vmem>>, vector<1x128xf32>
    %c0_5 = arith.constant 0 : index
    %c0_6 = arith.constant 0 : index
    %4 = vector.load %arg5[%c0_5, %c0_6] : memref<1x128xf32, #tpu.memory_space<vmem>>, vector<1x128xf32>
    %5 = vector.broadcast %3 : vector<1x128xf32> to vector<128x128xf32>
    %6 = arith.mulf %2, %5 : vector<128x128xf32>
    %7 = vector.broadcast %4 : vector<1x128xf32> to vector<128x128xf32>
    %8 = arith.addf %6, %7 : vector<128x128xf32>
    %9 = math.exp %8 : vector<128x128xf32>
    %cst_7 = arith.constant 1.000000e+00 : f32
    %10 = vector.broadcast %cst_7 : f32 to vector<128x128xf32>
    %11 = arith.subf %9, %10 : vector<128x128xf32>
    %12 = math.absf %8 : vector<128x128xf32>
    %cst_8 = arith.constant 1.000000e-03 : f32
    %13 = vector.broadcast %cst_8 : f32 to vector<128x128xf32>
    %14 = arith.cmpf olt, %12, %13 : vector<128x128xf32>
    %cst_9 = arith.constant 5.000000e-01 : f32
    %15 = vector.broadcast %cst_9 : f32 to vector<128x128xf32>
    %16 = arith.mulf %15, %8 : vector<128x128xf32>
    %17 = arith.mulf %16, %8 : vector<128x128xf32>
    %18 = arith.addf %8, %17 : vector<128x128xf32>
    %19 = arith.select %14, %18, %11 : vector<128x128xi1>, vector<128x128xf32>
    %cst_10 = arith.constant 0.000000e+00 : f32
    %20 = vector.broadcast %cst_10 : f32 to vector<128x128xf32>
    %21 = arith.cmpf ogt, %8, %20 : vector<128x128xf32>
    %22 = arith.select %21, %8, %19 : vector<128x128xi1>, vector<128x128xf32>
    %23 = tpu.transpose %22, [1, 0] : vector<128x128xf32> -> vector<128x128xf32>
    %c0_11 = arith.constant 0 : index
    %c0_12 = arith.constant 0 : index
    %24 = vector.load %arg6[%c0_11, %c0_12] : memref<128x128xf32, #tpu.memory_space<vmem>>, vector<128x128xf32>
    tpu.vector_store %arg6[%c0_11, %c0_12], %23 {strides = array<i32>} : memref<128x128xf32, #tpu.memory_space<vmem>>, vector<128x128xf32>,
    return
  }
  func.func @transform_0(%arg0: i32, %arg1: i32) -> (i32, i32) {
    %c0_i32 = arith.constant 0 : i32
    %c0_i32_0 = arith.constant 0 : i32
    return %arg0, %c0_i32 : i32, i32
  }
  func.func @transform_1(%arg0: i32, %arg1: i32) -> (i32, i32) {
    %c0_i32 = arith.constant 0 : i32
    %c0_i32_0 = arith.constant 0 : i32
    return %c0_i32, %arg1 : i32, i32
  }
  func.func @transform_2(%arg0: i32, %arg1: i32) -> (i32, i32) {
    %c0_i32 = arith.constant 0 : i32
    %c0_i32_0 = arith.constant 0 : i32
    return %c0_i32, %arg1 : i32, i32
  }
  func.func @transform_3(%arg0: i32, %arg1: i32) -> (i32, i32) {
    %c0_i32 = arith.constant 0 : i32
    %c0_i32_0 = arith.constant 0 : i32
    return %c0_i32, %arg1 : i32, i32
  }
  func.func @transform_4(%arg0: i32, %arg1: i32) -> (i32, i32) {
    %c0_i32 = arith.constant 0 : i32
    return %arg1, %arg0 : i32, i32
  }
}

</mosaic_0001>

<bundles_post_ra>
// kernel: block_forward.3
= control target key start
LH: loop header
LB: loop body
LE: loop exit
PB: predicated region body
PF: predicated region fallthrough
CT: control target
= control target key end

     0   :  { %vm119_vm0 = vcmask 1041408   ;;  %vm94_vm1 = vcmask 293888   ;;  %s954_s1 = inlined_call_operand.vmem [shape: bf16[36,128], index: 1, kind: input, shape index: {}]   ;;  %s955_s0 = inlined_call_operand.vmem [shape: bf16[128,36], index: 0, kind: input, shape index: {}]   ;;  %s956_s2 = inlined_call_operand.vmem [shape: f32[1,128], index: 2, kind: input, shape index: {}]   ;;  %s957_s3 = inlined_call_operand.vmem [shape: f32[1,128], index: 3, kind: input, shape index: {}]   ;;  %s958_s4 = inlined_call_operand.vmem [shape: f32[128,128], index: 4, kind: output, shape index: {}]  }
   0x1   :  { %v572_v0 = vld [vmem:[%s954_s1 + $0x10] ss:$0 sps:$4 sm:$0x33]   ;;  %v573_v1 = vld [vmem:[%s954_s1 + $0x8] sm:$0xff]   ;;  %v575_v3 = vld [vmem:[%s955_s0] sm:$0xff]  }
   0x2   :  { %570 = vmatprep.subr.msk.bf16.mxu0 %vm119_vm0, %v572_v0  ;;  %v121_v2 = vsel %vm119_vm0, %v572_v0, 0  ;;  %571 = vmatprep.subr.msk.bf16.mxu1 %vm119_vm0, %v572_v0  ;;  %v574_v4 = vld [vmem:[%s954_s1] sm:$0xff]   ;;  %v576_v6 = vld [vmem:[%s955_s0 + $0x8] sm:$0xff]   ;;  %v578_v8 = vld [vmem:[%s955_s0 + $0x10] sm:$0xff]  }
   0x3   :  { %543 = vmatpush3.bf16.msra.mxu0 %v121_v2  ;;  %567 = vmatpush3.bf16.msra.mxu1 %v121_v2  ;;  %v577_v5 = vld [vmem:[%s955_s0 + $0x20] sm:$0xff]   ;;  %v579_v7 = vld [vmem:[%s955_s0 + $0x28] sm:$0xff]   ;;  %v581_v9 = vld [vmem:[%s955_s0 + $0x30] sm:$0xff]  }
   0x4   :  { %544 = vmatprep.subr.bf16.mxu0 %v573_v1  ;;  %565 = vmatprep.subr.bf16.mxu1 %v573_v1  ;;  %v580_v10 = vld [vmem:[%s955_s0 + $0x18] sm:$0xff]   ;;  %v684_v13 = vld [vmem:[%s956_s2] ss:$0 sm:$0xff] }
   0x5   :  { %548 = vmatprep.mubr.msk.bf16.mxu0 %vm94_vm1, %v575_v3  ;;  %556 = vmatprep.mubr.msk.bf16.mxu1 %vm94_vm1, %v577_v5  ;;  %v582_v11 = vld [vmem:[%s955_s0 + $0x38] sm:$0xff]   ;;  %v690_v16 = vld [vmem:[%s957_s3] ss:$0 sm:$0xff] }
   0x7   :  { %545 = vmatpush3.bf16.msra.mxu0 %v573_v1  ;;  %568 = vmatpush3.bf16.msra.mxu1 %v573_v1 }
   0x8   :  { %546 = vmatprep.subr.bf16.mxu0 %v574_v4  ;;  %566 = vmatprep.subr.bf16.mxu1 %v574_v4 }
   0xb   :  { %547 = vmatpush3.bf16.msra.mxu0 %v574_v4  ;;  %569 = vmatpush3.bf16.msra.mxu1 %v574_v4 }
   0xe   :  { %549 = vmatmul.mubr.msk.bf16.vlgmr.msra.gmra.mxu0 %vm94_vm1, %v576_v6  ;;  %557 = vmatmul.mubr.msk.bf16.vlgmr.msra.gmra.mxu1 %vm94_vm1, %v579_v7 }
   0xf   :  { %552 = vmatprep.mubr.msk.bf16.mxu0 %vm94_vm1, %v578_v8  ;;  %560 = vmatprep.mubr.msk.bf16.mxu1 %vm94_vm1, %v581_v9 }
  0x16   :  { %553 = vmatmul.mubr.msk.bf16.gmra.mxu0 %vm94_vm1, %v580_v10  ;;  %561 = vmatmul.mubr.msk.bf16.gmra.mxu1 %vm94_vm1, %v582_v11 }
  0xce   :  { %v550_v12 = vpop.f32.mrf.mxu0  ;;  %v558_v30 = vpop.f32.mrf.mxu1 }
  0xcf   :  { %v230_v17 = vmul.f32 %v550_v12, %v684_v13  ;;  %v238_v9 = vmul.f32 %v558_v30, %v684_v13 }
  0xd0   :  { %v157_v14 = vpop.f32.mrf.mxu0  ;;  %v189_v39 = vpop.f32.mrf.mxu1 }
  0xd1   :  { %v228_v15 = vmul.f32 %v684_v13, %v157_v14  ;;  %v696_v22 = vadd.f32 %v690_v16, %v230_v17  ;;  %v236_v52 = vmul.f32 %v684_v13, %v189_v39  ;;  %v761_v30 = vadd.f32 %v690_v16, %v238_v9 }
  0xd2   :  { %v551_v18 = vpop.f32.mrf.mxu0  ;;  %v559_v46 = vpop.f32.mrf.mxu1 }
  0xd3   :  { %v250_v19 = vadd.f32 %v690_v16, %v228_v15  ;;  %v231_v23 = vmul.f32 %v551_v18, %v684_v13  ;;  %v270_v33 = vmul.f32 1.442695, %v696_v22  ;;  %v348_v50 = vmul.f32 0.5, %v696_v22 }
  0xd4   :  { %v160_v20 = vpop.f32.mrf.mxu0  ;;  %v192_v56 = vpop.f32.mrf.mxu1  ;;  %v737_v1 = vadd.f32 %v690_v16, %v236_v52  ;;  %v316_v4 = vand.u32 2147483647, %v696_v22  ;;  %vm412_vm7 = vcmp.gt.f32.partialorder %v696_v22, 0.0 }
  0xd5   :  { %v229_v21 = vmul.f32 %v684_v13, %v160_v20  ;;  %v266_v25 = vmul.f32 1.442695, %v250_v19  ;;  %v704_v29 = vadd.f32 %v690_v16, %v231_v23  ;;  %v346_v37 = vmul.f32 0.5, %v250_v19 }
  0xd6   :  { %v554_v24 = vpop.f32.mrf.mxu0  ;;  %v314_v49 = vand.u32 2147483647, %v250_v19  ;;  %v364_v60 = vmul.f32 %v348_v50, %v696_v22  ;;  %v733_v61 = vpop.f32.mrf.mxu1  ;;  %vm410_vm3 = vcmp.gt.f32.partialorder %v250_v19, 0.0  ;;  %v237_v2 = vmul.f32 %v684_v13, %v192_v56 }
  0xd7   :  { %v700_v26 = vadd.f32 %v690_v16, %v229_v21  ;;  %583 = vpow2.f32 %v266_v25  ;;  %v234_v38 = vmul.f32 %v554_v24, %v684_v13  ;;  %v272_v40 = vmul.f32 1.442695, %v704_v29 }
  0xd8   :  { %v173_v27 = vpop.f32.mrf.mxu0  ;;  %v362_v43 = vmul.f32 %v346_v37, %v250_v19  ;;  %vm330_vm2 = vcmp.lt.f32.partialorder %v314_v49, 0.001  ;;  %v349_v63 = vmul.f32 0.5, %v704_v29  ;;  %v380_v10 = vadd.f32 %v364_v60, %v696_v22  ;;  %v205_v11 = vpop.f32.mrf.mxu1 }
  0xd9   :  { %v232_v28 = vmul.f32 %v684_v13, %v173_v27  ;;  %v268_v32 = vmul.f32 1.442695, %v700_v26  ;;  %v347_v44 = vmul.f32 0.5, %v700_v26  ;;  %v720_v45 = vadd.f32 %v690_v16, %v234_v38 }
  0xda   :  { %v555_v31 = vpop.f32.mrf.mxu0  ;;  %v378_v53 = vadd.f32 %v362_v43, %v250_v19  ;;  %v315_v59 = vand.u32 2147483647, %v700_v26  ;;  %vm411_vm5 = vcmp.gt.f32.partialorder %v700_v26, 0.0  ;;  %v365_v15 = vmul.f32 %v349_v63, %v704_v29 }
  0xdb   :  { %v709_v34 = vadd.f32 %v690_v16, %v232_v28  ;;  %585 = vpow2.f32 %v268_v32  ;;  %v235_v47 = vmul.f32 %v555_v31, %v684_v13  ;;  %v363_v54 = vmul.f32 %v347_v44, %v700_v26  ;;  %v763_v31 = vpop.f32.mrf.mxu1 }
  0xdc   :  { %v176_v35 = vpop.f32.mrf.mxu0  ;;  %587 = vpow2.f32 %v270_v33  ;;  %v278_v58 = vmul.f32 1.442695, %v720_v45  ;;  %vm331_vm4 = vcmp.lt.f32.partialorder %v315_v59, 0.001  ;;  %vm752_vm6 = vcmp.lt.f32.partialorder %v316_v4, 0.001 }
  0xdd   :  { %v233_v36 = vmul.f32 %v684_v13, %v176_v35  ;;  %589 = vpow2.f32 %v272_v40  ;;  %v274_v42 = vmul.f32 1.442695, %v709_v34  ;;  %v728_v55 = vadd.f32 %v690_v16, %v235_v47 }
  0xde   :  { %v379_v6 = vadd.f32 %v363_v54, %v700_v26  ;;  %v350_v17 = vmul.f32 0.5, %v709_v34  ;;  %v317_v23 = vand.u32 2147483647, %v704_v29  ;;  %v282_v27 = vmul.f32 1.442695, %v737_v1 }
  0xdf   :  { %v715_v41 = vadd.f32 %v690_v16, %v233_v36  ;;  %591 = vpow2.f32 %v274_v42  ;;  %v280_v7 = vmul.f32 1.442695, %v728_v55  ;;  %v239_v35 = vmul.f32 %v559_v46, %v684_v13  ;;  %v208_v46 = vpop.f32.mrf.mxu1 }
  0xe0   :  { %v366_v32 = vmul.f32 %v350_v17, %v709_v34  ;;  %vm771_vm8 = vcmp.lt.f32.partialorder %v317_v23, 0.001  ;;  %v318_v38 = vand.u32 2147483647, %v709_v34  ;;  %v240_v44 = vmul.f32 %v684_v13, %v205_v11 }
  0xe1   :  { %v276_v48 = vmul.f32 1.442695, %v715_v41  ;;  %v351_v33 = vmul.f32 0.5, %v715_v41  ;;  %vm413_vm9 = vcmp.gt.f32.partialorder %v704_v29, 0.0  ;;  %v785_v49 = vadd.f32 %v690_v16, %v239_v35 }
  0xe2   :  { %vm334_vm10 = vcmp.lt.f32.partialorder %v318_v38, 0.001  ;;  %v286_v54 = vmul.f32 1.442695, %v761_v30  ;;  %vm414_vm11 = vcmp.gt.f32.partialorder %v709_v34, 0.0  ;;  %v353_v60 = vmul.f32 0.5, %v728_v55 }
  0xe3   :  { %593 = vpow2.f32 %v276_v48  ;;  %v367_v47 = vmul.f32 %v351_v33, %v715_v41  ;;  %v352_v48 = vmul.f32 0.5, %v720_v45  ;;  %vm415_vm13 = vcmp.gt.f32.partialorder %v715_v41, 0.0 }
  0xe4   :  { %v584_v51 = vpop.eup %583  ;;  %595 = vpow2.f32 %v278_v58  ;;  %v241_v58 = vmul.f32 %v684_v13, %v208_v46  ;;  %v321_v9 = vand.u32 2147483647, %v728_v55  ;;  %v243_v23 = vmul.f32 %v763_v31, %v684_v13 }
  0xe5   :  { %v515_v57 = vadd.f32 -1.0, %v584_v51  ;;  %597 = vpow2.f32 %v280_v7  ;;  %v319_v51 = vand.u32 2147483647, %v715_v41  ;;  %v383_v59 = vadd.f32 %v367_v47, %v715_v41 }
  0xe6   :  { %599 = vpow2.f32 %v282_v27  ;;  %v811_v7 = vadd.f32 %v690_v16, %v241_v58  ;;  %vm416_vm15 = vcmp.gt.f32.partialorder %v720_v45, 0.0  ;;  %vm834_vm0 = vcmp.lt.f32.partialorder %v321_v9, 0.001 }
  0xe7   :  { %v394_v62 = vsel %vm330_vm2, %v378_v53, %v515_v57  ;;  %v791_v57 = vadd.f32 %v690_v16, %v240_v44  ;;  %vm799_vm12 = vcmp.lt.f32.partialorder %v319_v51, 0.001  ;;  %v852_v37 = vadd.f32 %v690_v16, %v243_v23 }
  0xe8   :  { %v586_v0 = vpop.eup %585  ;;  %v426_v3 = vsel %vm410_vm3, %v250_v19, %v394_v62  ;;  %v749_v19 = vadd.f32 %v690_v16, %v237_v2  ;;  %v354_v2 = vmul.f32 0.5, %v737_v1  ;;  %v292_v33 = vmul.f32 1.442695, %v811_v7 }
  0xe9   :  { %442 = vxpose.xlu0.b32.start [1/16] %v426_v3, 128  ;;  %v516_v5 = vadd.f32 -1.0, %v586_v0  ;;  %v588_v8 = vpop.eup %587  ;;  %v320_v0 = vand.u32 2147483647, %v720_v45  ;;  %vm417_vm2 = vcmp.gt.f32.partialorder %v728_v55, 0.0  ;;  %vm418_vm3 = vcmp.gt.f32.partialorder %v737_v1, 0.0 }
  0xea   :  { %v517_v14 = vadd.f32 -1.0, %v588_v8  ;;  %v590_v18 = vpop.eup %589  ;;  %v284_v42 = vmul.f32 1.442695, %v749_v19  ;;  %v358_v51 = vmul.f32 0.5, %v791_v57  ;;  %v325_v58 = vand.u32 2147483647, %v785_v49 }
  0xeb   :  { %v395_v12 = vsel %vm331_vm4, %v379_v6, %v516_v5  ;;  %v518_v25 = vadd.f32 -1.0, %v590_v18  ;;  %v288_v5 = vmul.f32 1.442695, %v785_v49  ;;  %vm818_vm14 = vcmp.lt.f32.partialorder %v320_v0, 0.001 }
  0xec   :  { %v427_v20 = vsel %vm411_vm5, %v700_v26, %v395_v12  ;;  %v396_v24 = vsel %vm752_vm6, %v380_v10, %v517_v14  ;;  %v592_v28 = vpop.eup %591  ;;  %v381_v26 = vadd.f32 %v365_v15, %v704_v29  ;;  %601 = vpow2.f32 %v284_v42 }
  0xed   :  { %443 = vxpose.xlu0.b32.cont [2/16] %v427_v20, 128  ;;  %v428_v36 = vsel %vm412_vm7, %v696_v22, %v396_v24  ;;  %v519_v40 = vadd.f32 -1.0, %v592_v28  ;;  %v382_v22 = vadd.f32 %v366_v32, %v709_v34  ;;  %603 = vpow2.f32 %v286_v54 }
  0xee   :  { %v397_v39 = vsel %vm771_vm8, %v381_v26, %v518_v25  ;;  %v369_v10 = vmul.f32 %v353_v60, %v728_v55  ;;  %v370_v14 = vmul.f32 %v354_v2, %v737_v1  ;;  %605 = vpow2.f32 %v288_v5 }
  0xef   :  { %v429_v50 = vsel %vm413_vm9, %v704_v29, %v397_v39  ;;  %v398_v52 = vsel %vm334_vm10, %v382_v22, %v519_v40  ;;  %v368_v29 = vmul.f32 %v352_v48, %v720_v45  ;;  %v290_v18 = vmul.f32 1.442695, %v791_v57 }
  0xf0   :  { %v594_v43 = vpop.eup %593  ;;  %v430_v62 = vsel %vm414_vm11, %v709_v34, %v398_v52  ;;  %v242_v34 = vmul.f32 %v733_v61, %v684_v13  ;;  %v355_v61 = vmul.f32 0.5, %v749_v19  ;;  %v385_v25 = vadd.f32 %v369_v10, %v728_v55 }
  0xf1   :  { %444 = vxpose.xlu0.b32.cont [3/16] %v428_v36, 128  ;;  %v520_v53 = vadd.f32 -1.0, %v594_v43  ;;  %v596_v56 = vpop.eup %595  ;;  %v384_v8 = vadd.f32 %v368_v29, %v720_v45  ;;  %v386_v28 = vadd.f32 %v370_v14, %v737_v1  ;;  %v356_v32 = vmul.f32 0.5, %v761_v30 }
  0xf2   :  { %v521_v4 = vadd.f32 -1.0, %v596_v56  ;;  %v598_v6 = vpop.eup %597  ;;  %v828_v21 = vadd.f32 %v690_v16, %v242_v34  ;;  %v371_v26 = vmul.f32 %v355_v61, %v749_v19  ;;  %607 = vpow2.f32 %v290_v18 }
  0xf3   :  { %v399_v3 = vsel %vm799_vm12, %v383_v59, %v520_v53  ;;  %v522_v17 = vadd.f32 -1.0, %v598_v6  ;;  %v600_v20 = vpop.eup %599  ;;  %v372_v40 = vmul.f32 %v356_v32, %v761_v30  ;;  %v357_v42 = vmul.f32 0.5, %v785_v49 }
  0xf4   :  { %v431_v11 = vsel %vm415_vm13, %v715_v41, %v399_v3  ;;  %v400_v15 = vsel %vm818_vm14, %v384_v8, %v521_v4  ;;  %v322_v41 = vand.u32 2147483647, %v737_v1  ;;  %v523_v31 = vadd.f32 -1.0, %v600_v20 }
  0xf5   :  { %445 = vxpose.xlu0.b32.cont [4/16] %v429_v50, 128  ;;  %v432_v27 = vsel %vm416_vm15, %v720_v45, %v400_v15  ;;  %v401_v13 = vsel %vm834_vm0, %v385_v25, %v522_v17  ;;  %v323_v45 = vand.u32 2147483647, %v749_v19  ;;  %v387_v39 = vadd.f32 %v371_v26, %v749_v19 }
  0xf6   :  { %vm846_vm1 = vcmp.lt.f32.partialorder %v322_v41, 0.001  ;;  %v433_v38 = vsel %vm417_vm2, %v728_v55, %v401_v13  ;;  %609 = vpow2.f32 %v292_v33  ;;  %v294_v16 = vmul.f32 1.442695, %v828_v21 }
  0xf7   :  { %v402_v43 = vsel %vm846_vm1, %v386_v28, %v523_v31  ;;  %vm863_vm4 = vcmp.lt.f32.partialorder %v323_v45, 0.001  ;;  %v324_v55 = vand.u32 2147483647, %v761_v30  ;;  %vm419_vm5 = vcmp.gt.f32.partialorder %v749_v19, 0.0 }
  0xf8   :  { %v434_v47 = vsel %vm418_vm3, %v737_v1, %v402_v43  ;;  %v388_v48 = vadd.f32 %v372_v40, %v761_v30  ;;  %v373_v50 = vmul.f32 %v357_v42, %v785_v49  ;;  %611 = vpow2.f32 %v294_v16 }
  0xf9   :  { %446 = vxpose.xlu0.b32.cont [5/16] %v430_v62, 128  ;;  %v602_v35 = vpop.eup %601  ;;  %v296_v54 = vmul.f32 1.442695, %v852_v37  ;;  %vm340_vm6 = vcmp.lt.f32.partialorder %v324_v55, 0.001  ;;  %vm420_vm7 = vcmp.gt.f32.partialorder %v761_v30, 0.0  ;;  %v359_v29 = vmul.f32 0.5, %v811_v7 }
  0xfa   :  { %v524_v44 = vadd.f32 -1.0, %v602_v35  ;;  %v604_v46 = vpop.eup %603  ;;  %v389_v59 = vadd.f32 %v373_v50, %v785_v49  ;;  %v374_v63 = vmul.f32 %v358_v51, %v791_v57  ;;  %vm341_vm8 = vcmp.lt.f32.partialorder %v325_v58, 0.001 }
  0xfb   :  { %v525_v53 = vadd.f32 -1.0, %v604_v46  ;;  %v606_v56 = vpop.eup %605  ;;  %613 = vpow2.f32 %v296_v54  ;;  %v326_v2 = vand.u32 2147483647, %v791_v57  ;;  %vm421_vm9 = vcmp.gt.f32.partialorder %v785_v49, 0.0 }
  0xfc   :  { %v403_v52 = vsel %vm863_vm4, %v387_v39, %v524_v44  ;;  %v526_v62 = vadd.f32 -1.0, %v606_v56  ;;  %v390_v6 = vadd.f32 %v374_v63, %v791_v57  ;;  %v360_v34 = vmul.f32 0.5, %v828_v21 }
  0xfd   :  { %447 = vxpose.xlu0.b32.cont [6/16] %v431_v11, 128  ;;  %v435_v1 = vsel %vm419_vm5, %v749_v19, %v403_v52  ;;  %v404_v60 = vsel %vm340_vm6, %v388_v48, %v525_v53  ;;  %v375_v19 = vmul.f32 %v359_v29, %v811_v7  ;;  %vm342_vm10 = vcmp.lt.f32.partialorder %v326_v2, 0.001 }
  0xfe   :  { %v436_v3 = vsel %vm420_vm7, %v761_v30, %v404_v60  ;;  %v405_v4 = vsel %vm341_vm8, %v389_v59, %v526_v62  ;;  %v327_v9 = vand.u32 2147483647, %v811_v7  ;;  %vm422_vm11 = vcmp.gt.f32.partialorder %v791_v57, 0.0 }
  0xff   :  { %v608_v0 = vpop.eup %607  ;;  %v437_v10 = vsel %vm421_vm9, %v785_v49, %v405_v4  ;;  %v391_v30 = vadd.f32 %v375_v19, %v811_v7  ;;  %v376_v14 = vmul.f32 %v360_v34, %v828_v21  ;;  %v361_v61 = vmul.f32 0.5, %v852_v37 }
 0x100   :  { %v527_v5 = vadd.f32 -1.0, %v608_v0  ;;  %vm343_vm12 = vcmp.lt.f32.partialorder %v327_v9, 0.001  ;;  %v328_v17 = vand.u32 2147483647, %v828_v21  ;;  %vm423_vm13 = vcmp.gt.f32.partialorder %v811_v7, 0.0 }
 0x101   :  { %448 = vxpose.xlu0.b32.cont [7/16] %v432_v27, 128  ;;  %v392_v41 = vadd.f32 %v376_v14, %v828_v21  ;;  %v377_v23 = vmul.f32 %v361_v61, %v852_v37  ;;  %v329_v25 = vand.u32 2147483647, %v852_v37  ;;  %vm424_vm15 = vcmp.gt.f32.partialorder %v828_v21, 0.0 }
 0x102   :  { %v406_v11 = vsel %vm342_vm10, %v390_v6, %v527_v5  ;;  %vm344_vm14 = vcmp.lt.f32.partialorder %v328_v17, 0.001  ;;  %vm425_vm1 = vcmp.gt.f32.partialorder %v852_v37, 0.0 }
 0x103   :  { %v610_v8 = vpop.eup %609  ;;  %v438_v18 = vsel %vm422_vm11, %v791_v57, %v406_v11  ;;  %v393_v26 = vadd.f32 %v377_v23, %v852_v37  ;;  %vm345_vm0 = vcmp.lt.f32.partialorder %v329_v25, 0.001 }
 0x104   :  { %v528_v12 = vadd.f32 -1.0, %v610_v8 }
 0x105   :  { %449 = vxpose.xlu0.b32.cont [8/16] %v433_v38, 128  ;;  %v612_v15 = vpop.eup %611 }
 0x106   :  { %v407_v49 = vsel %vm343_vm12, %v391_v30, %v528_v12  ;;  %v529_v20 = vadd.f32 -1.0, %v612_v15 }
 0x107   :  { %v439_v27 = vsel %vm423_vm13, %v811_v7, %v407_v49 }
 0x108   :  { %v614_v24 = vpop.eup %613  ;;  %v408_v28 = vsel %vm344_vm14, %v392_v41, %v529_v20 }
 0x109   :  { %450 = vxpose.xlu0.b32.cont [9/16] %v434_v47, 128  ;;  %v530_v57 = vadd.f32 -1.0, %v614_v24  ;;  %v440_v32 = vsel %vm424_vm15, %v828_v21, %v408_v28 }
 0x10b   :  { %v409_v13 = vsel %vm345_vm0, %v393_v26, %v530_v57 }
 0x10c   :  { %v441_v31 = vsel %vm425_vm1, %v852_v37, %v409_v13 }
 0x10d   :  { %451 = vxpose.xlu0.b32.cont [10/16] %v435_v1, 128 }
 0x111   :  { %452 = vxpose.xlu0.b32.cont [11/16] %v436_v3, 128 }
 0x115   :  { %453 = vxpose.xlu0.b32.cont [12/16] %v437_v10, 128 }
 0x119   :  { %454 = vxpose.xlu0.b32.cont [13/16] %v438_v18, 128 }
 0x11d   :  { %455 = vxpose.xlu0.b32.cont [14/16] %v439_v27, 128 }
 0x121   :  { %456 = vxpose.xlu0.b32.cont [15/16] %v440_v32, 128 }
 0x125   :  { %457 = vxpose.xlu0.b32.end [16/16] %v441_v31, 128 }
 0x165   :  { %v458_v33 = vpop.trf.xlu0 }
 0x166   :  { %474 = vst [vmem:[%s958_s4] sm:$0xff] %v458_v33 }
 0x169   :  { %v459_v7 = vpop.trf.xlu0 }
 0x16a   :  { %475 = vst [vmem:[%s958_s4 + $0x8] sm:$0xff] %v459_v7 }
 0x16d   :  { %v460_v35 = vpop.trf.xlu0 }
 0x16e   :  { %476 = vst [vmem:[%s958_s4 + $0x10] sm:$0xff] %v460_v35 }
 0x171   :  { %v461_v21 = vpop.trf.xlu0 }
 0x172   :  { %477 = vst [vmem:[%s958_s4 + $0x18] sm:$0xff] %v461_v21 }
 0x175   :  { %v462_v36 = vpop.trf.xlu0 }
 0x176   :  { %478 = vst [vmem:[%s958_s4 + $0x20] sm:$0xff] %v462_v36 }
 0x179   :  { %v463_v45 = vpop.trf.xlu0 }
 0x17a   :  { %479 = vst [vmem:[%s958_s4 + $0x28] sm:$0xff] %v463_v45 }
 0x17d   :  { %v464_v37 = vpop.trf.xlu0 }
 0x17e   :  { %480 = vst [vmem:[%s958_s4 + $0x30] sm:$0xff] %v464_v37 }
 0x181   :  { %v465_v38 = vpop.trf.xlu0 }
 0x182   :  { %481 = vst [vmem:[%s958_s4 + $0x38] sm:$0xff] %v465_v38 }
 0x185   :  { %v466_v39 = vpop.trf.xlu0 }
 0x186   :  { %482 = vst [vmem:[%s958_s4 + $0x40] sm:$0xff] %v466_v39 }
 0x189   :  { %v467_v40 = vpop.trf.xlu0 }
 0x18a   :  { %483 = vst [vmem:[%s958_s4 + $0x48] sm:$0xff] %v467_v40 }
 0x18d   :  { %v468_v42 = vpop.trf.xlu0 }
 0x18e   :  { %484 = vst [vmem:[%s958_s4 + $0x50] sm:$0xff] %v468_v42 }
 0x191   :  { %v469_v43 = vpop.trf.xlu0 }
 0x192   :  { %485 = vst [vmem:[%s958_s4 + $0x58] sm:$0xff] %v469_v43 }
 0x195   :  { %v470_v44 = vpop.trf.xlu0 }
 0x196   :  { %486 = vst [vmem:[%s958_s4 + $0x60] sm:$0xff] %v470_v44 }
 0x199   :  { %v471_v16 = vpop.trf.xlu0 }
 0x19a   :  { %487 = vst [vmem:[%s958_s4 + $0x68] sm:$0xff] %v471_v16 }
 0x19d   :  { %v472_v46 = vpop.trf.xlu0 }
 0x19e   :  { %488 = vst [vmem:[%s958_s4 + $0x70] sm:$0xff] %v472_v46 }
 0x1a1   :  { %v473_v22 = vpop.trf.xlu0 }
 0x1a2   :  { %489 = vst [vmem:[%s958_s4 + $0x78] sm:$0xff] %v473_v22 }

// kernel: block_forward.2
= control target key start
LH: loop header
LB: loop body
LE: loop exit
PB: predicated region body
PF: predicated region fallthrough
CT: control target
= control target key end

     0   :  { %vm113_vm0 = vcmask 1041408   ;;  %vm88_vm1 = vcmask 293888   ;;  %vm371_vm2 = vcmask 1040384   ;;  %s508_s1 = inlined_call_operand.vmem [shape: bf16[36,128], index: 1, kind: input, shape index: {}]   ;;  %s509_s0 = inlined_call_operand.vmem [shape: bf16[128,36], index: 0, kind: input, shape index: {}]   ;;  %s510_s2 = inlined_call_operand.vmem [shape: f32[1,2,128], index: 2, kind: output, shape index: {}]  }
   0x1   :  { %v438_v0 = vld [vmem:[%s508_s1 + $0x10] ss:$0 sps:$4 sm:$0x33]   ;;  %v439_v1 = vld [vmem:[%s508_s1 + $0x8] sm:$0xff]   ;;  %v441_v3 = vld [vmem:[%s509_s0] sm:$0xff]  }
   0x2   :  { %436 = vmatprep.subr.msk.bf16.mxu0 %vm113_vm0, %v438_v0  ;;  %v115_v2 = vsel %vm113_vm0, %v438_v0, 0  ;;  %437 = vmatprep.subr.msk.bf16.mxu1 %vm113_vm0, %v438_v0  ;;  %v440_v4 = vld [vmem:[%s508_s1] sm:$0xff]   ;;  %v442_v6 = vld [vmem:[%s509_s0 + $0x8] sm:$0xff]   ;;  %v443_v8 = vld [vmem:[%s509_s0 + $0x10] sm:$0xff]  }
   0x3   :  { %409 = vmatpush3.bf16.msra.mxu0 %v115_v2  ;;  %433 = vmatpush3.bf16.msra.mxu1 %v115_v2  ;;  %v445_v5 = vld [vmem:[%s509_s0 + $0x20] sm:$0xff]   ;;  %v446_v7 = vld [vmem:[%s509_s0 + $0x28] sm:$0xff]   ;;  %v447_v9 = vld [vmem:[%s509_s0 + $0x30] sm:$0xff]  }
   0x4   :  { %410 = vmatprep.subr.bf16.mxu0 %v439_v1  ;;  %431 = vmatprep.subr.bf16.mxu1 %v439_v1  ;;  %v444_v10 = vld [vmem:[%s509_s0 + $0x18] sm:$0xff]  }
   0x5   :  { %414 = vmatprep.mubr.msk.bf16.mxu0 %vm88_vm1, %v441_v3  ;;  %422 = vmatprep.mubr.msk.bf16.mxu1 %vm88_vm1, %v445_v5  ;;  %v448_v11 = vld [vmem:[%s509_s0 + $0x38] sm:$0xff]  }
   0x7   :  { %411 = vmatpush3.bf16.msra.mxu0 %v439_v1  ;;  %434 = vmatpush3.bf16.msra.mxu1 %v439_v1 }
   0x8   :  { %412 = vmatprep.subr.bf16.mxu0 %v440_v4  ;;  %432 = vmatprep.subr.bf16.mxu1 %v440_v4 }
   0xb   :  { %413 = vmatpush3.bf16.msra.mxu0 %v440_v4  ;;  %435 = vmatpush3.bf16.msra.mxu1 %v440_v4 }
   0xe   :  { %415 = vmatmul.mubr.msk.bf16.vlgmr.msra.gmra.mxu0 %vm88_vm1, %v442_v6  ;;  %423 = vmatmul.mubr.msk.bf16.vlgmr.msra.gmra.mxu1 %vm88_vm1, %v446_v7 }
   0xf   :  { %418 = vmatprep.mubr.msk.bf16.mxu0 %vm88_vm1, %v443_v8  ;;  %426 = vmatprep.mubr.msk.bf16.mxu1 %vm88_vm1, %v447_v9 }
  0x16   :  { %419 = vmatmul.mubr.msk.bf16.gmra.mxu0 %vm88_vm1, %v444_v10  ;;  %427 = vmatmul.mubr.msk.bf16.gmra.mxu1 %vm88_vm1, %v448_v11 }
  0xce   :  { %v416_v12 = vpop.f32.mrf.mxu0  ;;  %v424_v13 = vpop.f32.mrf.mxu1 }
  0xcf   :  { %v336_v23 = vmul.f32 %v416_v12, %v416_v12  ;;  %v344_v54 = vmul.f32 %v424_v13, %v424_v13 }
  0xd0   :  { %v151_v14 = vpop.f32.mrf.mxu0  ;;  %v183_v16 = vpop.f32.mrf.mxu1 }
  0xd1   :  { %v334_v18 = vmul.f32 %v151_v14, %v151_v14  ;;  %v342_v47 = vmul.f32 %v183_v16, %v183_v16 }
  0xd2   :  { %v417_v15 = vpop.f32.mrf.mxu0  ;;  %v425_v22 = vpop.f32.mrf.mxu1 }
  0xd3   :  { %v337_v27 = vmul.f32 %v417_v15, %v417_v15  ;;  %v345_v57 = vmul.f32 %v425_v22, %v425_v22 }
  0xd4   :  { %v154_v17 = vpop.f32.mrf.mxu0  ;;  %v186_v31 = vpop.f32.mrf.mxu1 }
  0xd5   :  { %v313_v19 = vadd.f32 %v154_v17, %v151_v14  ;;  %v335_v20 = vmul.f32 %v154_v17, %v154_v17  ;;  %v343_v51 = vmul.f32 %v186_v31, %v186_v31 }
  0xd6   :  { %v420_v21 = vpop.f32.mrf.mxu0  ;;  %v428_v39 = vpop.f32.mrf.mxu1 }
  0xd7   :  { %v314_v24 = vadd.f32 %v416_v12, %v313_v19  ;;  %v350_v25 = vadd.f32 %v335_v20, %v334_v18  ;;  %v340_v40 = vmul.f32 %v420_v21, %v420_v21  ;;  %v348_v3 = vmul.f32 %v428_v39, %v428_v39 }
  0xd8   :  { %v167_v26 = vpop.f32.mrf.mxu0  ;;  %v199_v46 = vpop.f32.mrf.mxu1 }
  0xd9   :  { %v351_v28 = vadd.f32 %v350_v25, %v336_v23  ;;  %v315_v29 = vadd.f32 %v417_v15, %v314_v24  ;;  %v338_v33 = vmul.f32 %v167_v26, %v167_v26  ;;  %v346_v62 = vmul.f32 %v199_v46, %v199_v46 }
  0xda   :  { %v421_v30 = vpop.f32.mrf.mxu0  ;;  %v429_v53 = vpop.f32.mrf.mxu1 }
  0xdb   :  { %v316_v32 = vadd.f32 %v315_v29, %v167_v26  ;;  %v352_v34 = vadd.f32 %v351_v28, %v337_v27  ;;  %v341_v43 = vmul.f32 %v421_v30, %v421_v30  ;;  %v349_v6 = vmul.f32 %v429_v53, %v429_v53 }
  0xdc   :  { %v170_v35 = vpop.f32.mrf.mxu0  ;;  %v202_v60 = vpop.f32.mrf.mxu1 }
  0xdd   :  { %v353_v36 = vadd.f32 %v352_v34, %v338_v33  ;;  %v317_v37 = vadd.f32 %v316_v32, %v170_v35  ;;  %v339_v38 = vmul.f32 %v170_v35, %v170_v35  ;;  %v347_v2 = vmul.f32 %v202_v60, %v202_v60 }
  0xdf   :  { %v318_v41 = vadd.f32 %v420_v21, %v317_v37  ;;  %v354_v42 = vadd.f32 %v353_v36, %v339_v38 }
  0xe1   :  { %v319_v44 = vadd.f32 %v421_v30, %v318_v41  ;;  %v355_v45 = vadd.f32 %v354_v42, %v340_v40 }
  0xe3   :  { %v356_v48 = vadd.f32 %v355_v45, %v341_v43  ;;  %v320_v49 = vadd.f32 %v319_v44, %v183_v16 }
  0xe5   :  { %v321_v50 = vadd.f32 %v320_v49, %v186_v31  ;;  %v357_v52 = vadd.f32 %v356_v48, %v342_v47 }
  0xe7   :  { %v322_v55 = vadd.f32 %v424_v13, %v321_v50  ;;  %v358_v56 = vadd.f32 %v357_v52, %v343_v51 }
  0xe9   :  { %v359_v58 = vadd.f32 %v358_v56, %v344_v54  ;;  %v323_v59 = vadd.f32 %v425_v22, %v322_v55 }
  0xeb   :  { %v324_v61 = vadd.f32 %v323_v59, %v199_v46  ;;  %v360_v63 = vadd.f32 %v359_v58, %v345_v57 }
  0xed   :  { %v361_v0 = vadd.f32 %v360_v63, %v346_v62  ;;  %v325_v1 = vadd.f32 %v324_v61, %v202_v60 }
  0xef   :  { %v326_v4 = vadd.f32 %v428_v39, %v325_v1  ;;  %v362_v5 = vadd.f32 %v361_v0, %v347_v2 }
  0xf1   :  { %v327_v7 = vadd.f32 %v429_v53, %v326_v4  ;;  %v363_v8 = vadd.f32 %v362_v5, %v348_v3 }
  0xf3   :  { %v328_v9 = vrot.slane %v327_v7, 4  ;;  %v364_v10 = vadd.f32 %v363_v8, %v349_v6 }
  0xf5   :  { %v329_v11 = vadd.f32 %v328_v9, %v327_v7  ;;  %v365_v12 = vrot.slane %v364_v10, 4 }
  0xf7   :  { %v330_v13 = vrot.slane %v329_v11, 2  ;;  %v366_v14 = vadd.f32 %v365_v12, %v364_v10 }
  0xf9   :  { %v331_v15 = vadd.f32 %v330_v13, %v329_v11  ;;  %v367_v16 = vrot.slane %v366_v14, 2 }
  0xfb   :  { %v332_v17 = vrot.slane %v331_v15, 1  ;;  %v368_v18 = vadd.f32 %v367_v16, %v366_v14 }
  0xfd   :  { %v369_v19 = vrot.slane %v368_v18, 1  ;;  %v333_v20 = vadd.f32 %v332_v17, %v331_v15 }
  0xff   :  { %v370_v21 = vadd.f32 %v369_v19, %v368_v18 }
 0x101   :  { %v372_v22 = vsel %vm371_vm2, %v333_v20, %v370_v21 }
 0x102   :  { %373 = vst [vmem:[%s510_s2] sm:$0x3] %v372_v22 }

</bundles_post_ra>
